<compile_context>
chip_gen: v5e
topology: v5e:2x2
jax: 0.10.0
libtpu: 0.0.40
codegen_flags: <defaults>
</compile_context>

<pallas_src>
import functools
import math

import jax
import jax.numpy as jnp
from jax.experimental import pallas as pl
from jax.experimental.pallas import tpu as pltpu

BN_EPS = 1e-5
NEG_SLOPE = 0.1
TK_MAX = 4096      # bf16 B block: 4096*512*2 B = 4 MiB -> <= ~9 MiB double-buffered worst case


# ---------------------------------------------------------------------------
# Tile-size selection (shared by weight prep and the matmul wrapper)
# ---------------------------------------------------------------------------
def _round_up(x, m):
    return ((x + m - 1) // m) * m


def _m_tiles(m):
    """M block: multiple of 16 (bf16 sublane packing), >=2 tiles when affordable."""
    if m >= 512:
        tm = 256
    elif m >= 16:
        tm = _round_up((m + 1) // 2, 16)
    else:
        tm = _round_up(m, 8)          # single full-dim tile for the tiny decoder layers
    return tm, _round_up(m, tm)


def _n_tiles(n):
    """N block: 256-aligned where possible (matches the 2x256x256 MXU)."""
    np_ = _round_up(n, 128)
    if np_ >= 1024:
        tn = 512
    elif np_ >= 256:
        tn = 256
    else:
        tn = 128
    return tn, _round_up(np_, tn)


def _k_tiles(k):
    """K block: 128-multiple tk whose grid covers K with minimal padding."""
    kp0 = _round_up(k, 128)
    nk_min = -(-kp0 // TK_MAX)
    best_tk, best_kp = None, None
    for nk in range(nk_min, nk_min + 5):
        tk = _round_up(-(-kp0 // nk), 128)
        kp = nk * tk
        if best_kp is None or kp < best_kp:
            best_tk, best_kp = tk, kp
    return best_tk, best_kp


# ---------------------------------------------------------------------------
# Pallas kernels: tiled matmul fused with optional LeakyReLU(0.1)
# ---------------------------------------------------------------------------
def _mm_act_kernel(a_ref, b_ref, o_ref, acc_ref, *, apply_act):
    k = pl.program_id(3)

    @pl.when(k == 0)
    def _():
        acc_ref[...] = jnp.zeros_like(acc_ref)

    acc_ref[...] += jnp.dot(a_ref[...], b_ref[...],
                            preferred_element_type=jnp.float32)

    @pl.when(k == pl.num_programs(3) - 1)
    def _():
        y = acc_ref[...]
        if apply_act:
            y = jnp.maximum(y, y * NEG_SLOPE)
        o_ref[...] = y.astype(o_ref.dtype)


def _mm_act_kernel_nored(a_ref, b_ref, o_ref, *, apply_act):
    # Single-K-step variant: no accumulator scratch, direct store.
    y = jnp.dot(a_ref[...], b_ref[...], preferred_element_type=jnp.float32)
    if apply_act:
        y = jnp.maximum(y, y * NEG_SLOPE)
    o_ref[...] = y.astype(o_ref.dtype)


def fused_matmul(a, b_p, n_out, apply_act, out_dtype=jnp.bfloat16):
    """act(a[g] @ b_p[g])[:, :n_out] for every g (leading "phase" batch axis).

    a   : (G, M, K)   activation patches (cast to bf16)
    b_p : (G, Kp, Np) prepared bf16 weights, already padded to the tile grid
    """
    G, M, K = a.shape
    Gb, Kp, Np = b_p.shape
    assert G == Gb, (G, Gb)
    tk, kp_expected = _k_tiles(K)
    tn, np_expected = _n_tiles(n_out)
    assert (Kp, Np) == (kp_expected, np_expected), (K, n_out, Kp, Np)
    tm, Mp = _m_tiles(M)

    a = a.astype(jnp.bfloat16)
    if (Mp, Kp) != (M, K):
        a = jnp.pad(a, ((0, 0), (0, Mp - M), (0, Kp - K)))

    nk = Kp // tk
    # TODO(synk): on v6e, pipeline_mode=pl.Buffered(3) on the B spec would give
    # deeper weight-stream buffering for the tiny-M layers.
    if nk == 1:
        out = pl.pallas_call(
            functools.partial(_mm_act_kernel_nored, apply_act=apply_act),
            out_shape=jax.ShapeDtypeStruct((G, Mp, Np), out_dtype),
            grid_spec=pltpu.PrefetchScalarGridSpec(
                num_scalar_prefetch=0,
                grid=(G, Mp // tm, Np // tn),
                in_specs=[
                    pl.BlockSpec((None, tm, Kp), lambda g, i, j: (g, i, 0)),
                    pl.BlockSpec((None, Kp, tn), lambda g, i, j: (g, 0, j)),
                ],
                out_specs=pl.BlockSpec((None, tm, tn), lambda g, i, j: (g, i, j)),
            ),
            compiler_params=pltpu.CompilerParams(
                dimension_semantics=("parallel", "parallel", "parallel")),
        )(a, b_p)
    else:
        out = pl.pallas_call(
            functools.partial(_mm_act_kernel, apply_act=apply_act),
            out_shape=jax.ShapeDtypeStruct((G, Mp, Np), out_dtype),
            grid_spec=pltpu.PrefetchScalarGridSpec(
                num_scalar_prefetch=0,
                grid=(G, Mp // tm, Np // tn, nk),
                in_specs=[
                    pl.BlockSpec((None, tm, tk), lambda g, i, j, k: (g, i, k)),
                    pl.BlockSpec((None, tk, tn), lambda g, i, j, k: (g, k, j)),
                ],
                out_specs=pl.BlockSpec((None, tm, tn), lambda g, i, j, k: (g, i, j)),
                scratch_shapes=[pltpu.VMEM((tm, tn), jnp.float32)],
            ),
            compiler_params=pltpu.CompilerParams(
                dimension_semantics=("parallel", "parallel", "parallel", "arbitrary")),
        )(a, b_p)

    if (Mp, Np) != (M, n_out):
        out = out[:, :M, :n_out]
    return out


# ---------------------------------------------------------------------------
# NHWC im2col glue + conv / deconv wrappers
# ---------------------------------------------------------------------------
def _im2col(x, k, stride, padding):
    """NHWC -> (N*OH*OW, k*k*C) patches, channel-minor (C in the lane dim)."""
    n, h, w, c = x.shape
    oh = (h + 2 * padding - k) // stride + 1
    ow = (w + 2 * padding - k) // stride + 1
    xp = jnp.pad(x, ((0, 0), (padding, padding), (padding, padding), (0, 0)))
    cols = []
    for i in range(k):
        for j in range(k):
            cols.append(xp[:, i:i + (oh - 1) * stride + 1:stride,
                           j:j + (ow - 1) * stride + 1:stride, :])
    patches = jnp.stack(cols, axis=3)                      # (n, oh, ow, k*k, c)
    return patches.reshape(n * oh * ow, k * k * c), oh, ow


def conv2d_fused(x, b_p, cout, k, stride, padding, apply_act, out_dtype=jnp.bfloat16):
    # TODO(synk): implicit GEMM (im2col with halo inside the kernel) would
    # remove the k^2 HBM patch amplification; patches are built by XLA here.
    n = x.shape[0]
    patches, oh, ow = _im2col(x.astype(jnp.bfloat16), k, stride, padding)
    y = fused_matmul(patches[None], b_p, cout, apply_act, out_dtype)
    return y[0].reshape(n, oh, ow, cout)


def deconv2x_fused(x, b_p, cout, apply_act, out_dtype=jnp.bfloat16):
    """ConvTranspose2d(k=4, s=2, p=1) as 4 dense per-phase 2x2 convs (one
    pallas_call with a leading phase grid axis) + 2x pixel shuffle."""
    n, h, w, c = x.shape
    xp = jnp.pad(x.astype(jnp.bfloat16), ((0, 0), (1, 1), (1, 1), (0, 0)))
    phases = []
    for a in (0, 1):
        for b in (0, 1):
            taps = [xp[:, a + du:a + du + h, b + dv:b + dv + w, :]
                    for du in (0, 1) for dv in (0, 1)]
            phases.append(jnp.stack(taps, axis=3).reshape(n * h * w, 4 * c))
    a_stack = jnp.stack(phases, axis=0)                    # (4, n*h*w, 4*c)
    y = fused_matmul(a_stack, b_p, cout, apply_act, out_dtype)   # (4, n*h*w, cout)
    # TODO(synk): the pixel shuffle + the downstream channel concat could be
    # fused into the matmul epilogue via offset out_specs / input_output_aliases.
    y = y.reshape(2, 2, n, h, w, cout).transpose(2, 3, 0, 4, 1, 5)
    return y.reshape(n, 2 * h, 2 * w, cout)


# ---------------------------------------------------------------------------
# Parameters (deterministic kaiming-normal init, a=0.1, like the module)
# ---------------------------------------------------------------------------
CONV_SPECS = [
    # name, cout, cin, kernel, stride, pad
    ("conv1",   64,    6, 7, 2, 3),
    ("conv2",   128,  64, 5, 2, 2),
    ("conv3",   256, 128, 5, 2, 2),
    ("conv3_1", 256, 256, 3, 1, 1),
    ("conv4",   512, 256, 3, 2, 1),
    ("conv4_1", 512, 512, 3, 1, 1),
    ("conv5",   512, 512, 3, 2, 1),
    ("conv5_1", 512, 512, 3, 1, 1),
    ("conv6",  1024, 512, 3, 2, 1),
    ("conv6_1", 1024, 1024, 3, 1, 1),
]
DECONV_SPECS = [("deconv5", 1024, 512), ("deconv4", 1026, 256),
                ("deconv3", 770, 128), ("deconv2", 386, 64)]
PREDICT_SPECS = [("pf6", 1024), ("pf5", 1026), ("pf4", 770),
                 ("pf3", 386), ("pf2", 194)]
UP_SPECS = ["up6to5", "up5to4", "up4to3", "up3to2"]

CONV_CFG = {name: (cout, k, s, p) for name, cout, cin, k, s, p in CONV_SPECS}
DECONV_COUT = {name: cout for name, cin, cout in DECONV_SPECS}


def _kaiming(key, shape):
    fan_in = shape[1] * shape[2] * shape[3]
    gain = math.sqrt(2.0 / (1.0 + 0.1 ** 2))
    std = gain / math.sqrt(fan_in)
    return jax.random.normal(key, shape, jnp.float32) * std


def init_params(key):
    params = {}
    n_layers = len(CONV_SPECS) + len(DECONV_SPECS) + len(PREDICT_SPECS) + len(UP_SPECS)
    keys = jax.random.split(key, n_layers)
    it = iter(keys)
    for name, cout, cin, k, _, _ in CONV_SPECS:
        params[name] = _kaiming(next(it), (cout, cin, k, k))
    for name, cin, cout in DECONV_SPECS:
        params[name] = _kaiming(next(it), (cin, cout, 4, 4))
    for name, cin in PREDICT_SPECS:
        params[name] = _kaiming(next(it), (2, cin, 3, 3))
    for name in UP_SPECS:
        params[name] = _kaiming(next(it), (2, 2, 4, 4))
    return params


# ---------------------------------------------------------------------------
# One-time weight preparation (im2col matrices, BN fold, tile padding, bf16)
# ---------------------------------------------------------------------------
def _pad_kn(wmat, n_out):
    k = wmat.shape[0]
    _, kp = _k_tiles(k)
    _, np_ = _n_tiles(n_out)
    return jnp.pad(wmat, ((0, kp - k), (0, np_ - n_out)))


def _conv_weight_matrix(w, scale=None):
    """(Cout, Cin, KH, KW) -> (1, Kp, Np) bf16, rows ordered (KH, KW, Cin)."""
    cout = w.shape[0]
    wmat = w.transpose(2, 3, 1, 0).reshape(-1, cout)
    if scale is not None:
        wmat = wmat * scale
    return _pad_kn(wmat, cout)[None].astype(jnp.bfloat16)


def _deconv_weight_matrices(w):
    """(Cin, Cout, 4, 4) ConvTranspose2d weight (stride 2, pad 1) ->
    (4, Kp, Np) bf16: one dense (4*Cin, Cout) matrix per output phase (a, b),
    rows ordered (du, dv, Cin) to match the per-phase 2x2 patch layout.
    Output pixel (2p+a, 2q+b) reads input (p+a+du-1, q+b+dv-1) with tap
    (ky, kx) = (3-2*du-a, 3-2*dv-b)."""
    cin, cout = w.shape[0], w.shape[1]
    mats = []
    for a in (0, 1):
        for b in (0, 1):
            taps = [w[:, :, 3 - 2 * du - a, 3 - 2 * dv - b]
                    for du in (0, 1) for dv in (0, 1)]        # 4 x (cin, cout)
            blk = jnp.stack(taps, axis=0).reshape(4 * cin, cout)
            mats.append(_pad_kn(blk, cout))
    return jnp.stack(mats, axis=0).astype(jnp.bfloat16)


def prepare_weights(params):
    prep = {}
    bn_scale = 1.0 / math.sqrt(1.0 + BN_EPS)   # eval-mode BN: mean=0, var=1, w=1, b=0
    for name, cout, cin, k, _, _ in CONV_SPECS:
        prep[name] = _conv_weight_matrix(params[name], bn_scale)
    for name, cin, cout in DECONV_SPECS:
        prep[name] = _deconv_weight_matrices(params[name])
    for name, cin in PREDICT_SPECS:
        prep[name] = _conv_weight_matrix(params[name])
    for name in UP_SPECS:
        prep[name] = _deconv_weight_matrices(params[name])
    return prep


# ---------------------------------------------------------------------------
# FlowNetDorefa forward (eval mode), NHWC / bf16 internally
# ---------------------------------------------------------------------------
def crop_like(x, target):
    return x[:, :target.shape[1], :target.shape[2], :]


def flownet_forward(weights, x_nchw):
    x = x_nchw.transpose(0, 2, 3, 1)   # NCHW -> NHWC once

    def conv_bn(name, inp):
        cout, k, s, p = CONV_CFG[name]
        return conv2d_fused(inp, weights[name], cout, k, s, p, apply_act=True)

    def deconv(name, inp):
        return deconv2x_fused(inp, weights[name], DECONV_COUT[name], apply_act=True)

    def predict(name, inp, out_dtype=jnp.bfloat16):
        return conv2d_fused(inp, weights[name], 2, 3, 1, 1, apply_act=False,
                            out_dtype=out_dtype)

    def upflow(name, inp):
        return deconv2x_fused(inp, weights[name], 2, apply_act=False)

    out_conv1 = conv_bn("conv1", x)
    out_conv2 = conv_bn("conv2", out_conv1)
    out_conv3 = conv_bn("conv3_1", conv_bn("conv3", out_conv2))
    out_conv4 = conv_bn("conv4_1", conv_bn("conv4", out_conv3))
    out_conv5 = conv_bn("conv5_1", conv_bn("conv5", out_conv4))
    out_conv6 = conv_bn("conv6_1", conv_bn("conv6", out_conv5))

    flow6 = predict("pf6", out_conv6)
    flow6_up = crop_like(upflow("up6to5", flow6), out_conv5)
    out_deconv5 = crop_like(deconv("deconv5", out_conv6), out_conv5)
    concat5 = jnp.concatenate((out_conv5, out_deconv5, flow6_up), axis=-1)

    flow5 = predict("pf5", concat5)
    flow5_up = crop_like(upflow("up5to4", flow5), out_conv4)
    out_deconv4 = crop_like(deconv("deconv4", concat5), out_conv4)
    concat4 = jnp.concatenate((out_conv4, out_deconv4, flow5_up), axis=-1)

    flow4 = predict("pf4", concat4)
    flow4_up = crop_like(upflow("up4to3", flow4), out_conv3)
    out_deconv3 = crop_like(deconv("deconv3", concat4), out_conv3)
    concat3 = jnp.concatenate((out_conv3, out_deconv3, flow4_up), axis=-1)

    flow3 = predict("pf3", concat3)
    flow3_up = crop_like(upflow("up3to2", flow3), out_conv2)
    out_deconv2 = crop_like(deconv("deconv2", concat3), out_conv2)
    concat2 = jnp.concatenate((out_conv2, out_deconv2, flow3_up), axis=-1)

    flow2 = predict("pf2", concat2, out_dtype=jnp.float32)
    # eval mode (self.training == False): return flow2 only, in NCHW like PyTorch
    return flow2.transpose(0, 3, 1, 2)


# ---------------------------------------------------------------------------
# Reference ConvTranspose2d(stride=2, padding=1) for lowering validation
# ---------------------------------------------------------------------------
def _ref_deconv_s2p1(x, w):
    """Direct transposed conv: x NHWC f32, w (Cin, Cout, 4, 4) f32."""
    n, h, w_, _ = x.shape
    cout = w.shape[1]
    acc = jnp.zeros((n, 2 * h + 2, 2 * w_ + 2, cout), jnp.float32)
    for ky in range(4):
        for kx in range(4):
            contrib = jnp.einsum("nhwc,cd->nhwd", x, w[:, :, ky, kx])
            acc = acc.at[:, ky:ky + 2 * h:2, kx:kx + 2 * w_:2, :].add(contrib)
    return acc[:, 1:1 + 2 * h, 1:1 + 2 * w_, :]


if __name__ == "__main__":
    key = jax.random.PRNGKey(0)
    pkey, xkey, vk1, vk2 = jax.random.split(key, 4)

    # --- numerical check of the dense per-phase transposed-conv lowering ----
    xv = jax.random.normal(vk1, (1, 5, 5, 6), jnp.float32)
    wv = jax.random.normal(vk2, (6, 4, 4, 4), jnp.float32)      # (Cin, Cout, 4, 4)
    ref = _ref_deconv_s2p1(xv, wv)
    got = deconv2x_fused(xv, _deconv_weight_matrices(wv), 4,
                         apply_act=False, out_dtype=jnp.float32)
    err = float(jnp.max(jnp.abs(got - ref)))
    scale = float(jnp.max(jnp.abs(ref)))
    assert err <= 0.05 * scale, ("deconv lowering mismatch", err, scale)

    # --- full FlowNetDorefa forward -----------------------------------------
    params = init_params(pkey)
    weights = jax.jit(prepare_weights)(params)          # one-time weight prep
    x = jax.random.normal(xkey, (2, 6, 64, 64), jnp.float32)

    flow2 = jax.jit(flownet_forward)(weights, x)
    flow2 = jax.block_until_ready(flow2)
    assert flow2.shape == (2, 2, 16, 16), flow2.shape
    assert bool(jnp.all(jnp.isfinite(flow2)))
    print("KERNEL_OK")
</pallas_src>

<mosaic_0001>
module attributes {stable_mosaic.version = 11 : i64} {
  func.func @_mm_act_kernel_nored(%arg0: i32, %arg1: i32, %arg2: i32, %arg3: memref<1x16x128xbf16, #tpu.memory_space<vmem>>, %arg4: memref<1x128x128xbf16, #tpu.memory_space<vmem>>, %arg5: memref<1x16x128xf32, #tpu.memory_space<vmem>>) attributes {dimension_semantics = [#tpu.dimension_semantics<parallel>, #tpu.dimension_semantics<parallel>, #tpu.dimension_semantics<parallel>], iteration_bounds = array<i64: 4, 2, 1>, scalar_prefetch = 0 : i64, scratch_operands = 0 : i64, tpu.core_type = #tpu.core_type<tc>, window_params = [{transform_indices = @transform_0, window_bounds = array<i64: 1, 16, 128>}, {transform_indices = @transform_1, window_bounds = array<i64: 1, 128, 128>}, {transform_indices = @transform_2, window_bounds = array<i64: 1, 16, 128>}]} {
    %c0 = arith.constant 0 : index
    %c0_0 = arith.constant 0 : index
    %c0_1 = arith.constant 0 : index
    %0 = vector.load %arg3[%c0, %c0_0, %c0_1] : memref<1x16x128xbf16, #tpu.memory_space<vmem>>, vector<1x16x128xbf16>
    %1 = vector.shape_cast %0 : vector<1x16x128xbf16> to vector<16x128xbf16>
    %c0_2 = arith.constant 0 : index
    %c0_3 = arith.constant 0 : index
    %c0_4 = arith.constant 0 : index
    %2 = vector.load %arg4[%c0_2, %c0_3, %c0_4] : memref<1x128x128xbf16, #tpu.memory_space<vmem>>, vector<1x128x128xbf16>
    %3 = vector.shape_cast %2 : vector<1x128x128xbf16> to vector<128x128xbf16>
    %cst = arith.constant dense<0.000000e+00> : vector<16x128xf32>
    %4 = tpu.matmul %1, %3, %cst {dimension_numbers = #tpu.dot_dimension_numbers<[1], [0], [0], [1], [0, 0, 1, 1], [], []>} : vector<16x128xbf16>, vector<128x128xbf16>, vector<16x128xf32> -> vector<16x128xf32>
    %c0_5 = arith.constant 0 : index
    %c0_6 = arith.constant 0 : index
    %c0_7 = arith.constant 0 : index
    %5 = vector.load %arg5[%c0_5, %c0_6, %c0_7] : memref<1x16x128xf32, #tpu.memory_space<vmem>>, vector<1x16x128xf32>
    %6 = vector.shape_cast %5 : vector<1x16x128xf32> to vector<16x128xf32>
    %7 = vector.shape_cast %4 : vector<16x128xf32> to vector<1x16x128xf32>
    tpu.vector_store %arg5[%c0_5, %c0_6, %c0_7], %7 {strides = array<i32>} : memref<1x16x128xf32, #tpu.memory_space<vmem>>, vector<1x16x128xf32>,
    return
  }
  func.func @transform_0(%arg0: i32, %arg1: i32, %arg2: i32) -> (i32, i32, i32) {
    %c0_i32 = arith.constant 0 : i32
    %c0_i32_0 = arith.constant 0 : i32
    return %arg0, %arg1, %c0_i32 : i32, i32, i32
  }
  func.func @transform_1(%arg0: i32, %arg1: i32, %arg2: i32) -> (i32, i32, i32) {
    %c0_i32 = arith.constant 0 : i32
    %c0_i32_0 = arith.constant 0 : i32
    return %arg0, %c0_i32, %arg2 : i32, i32, i32
  }
  func.func @transform_2(%arg0: i32, %arg1: i32, %arg2: i32) -> (i32, i32, i32) {
    %c0_i32 = arith.constant 0 : i32
    return %arg0, %arg1, %arg2 : i32, i32, i32
  }
}

</mosaic_0001>

<bundles_post_ra>
// kernel: tpu_custom_call.1
= control target key start
LH: loop header
LB: loop body
LE: loop exit
PB: predicated region body
PF: predicated region fallthrough
CT: control target
= control target key end

     0   :  { %s1066_s0 = inlined_call_operand.hbm [shape: bf16[4,32,128], index: 0, kind: input, shape index: {}]   ;;  %s1067_s1 = inlined_call_operand.hbm [shape: bf16[4,128,128], index: 1, kind: input, shape index: {}]   ;;  %s1068_s2 = inlined_call_operand.hbm [shape: f32[4,32,128], index: 2, kind: output, shape index: {}]  }
   0x1   :  { %1073 = sst [smem:[#allocation14_spill]] %s1066_s0 }
   0x2   :  { %7 = vsyncpa [#allocation3], 0 }
   0x3   :  { %9 = vsyncpa [#allocation3 + $0x1], 0 }
   0x4   :  { %10 = vsyncpa [#allocation6], 0 }
   0x5   :  { %12 = vsyncpa [#allocation6 + $0x1], 0 }
   0x6   :  { %13 = vsyncpa [#allocation4], 0 }
   0x7   :  { %15 = vsyncpa [#allocation4 + $0x1], 0  ;;  %s849_s9 = smov 0   ;;  %s851_s10 = smov 0  }
   0x8   :  { %s853_s11 = smov 0   ;;  %s855_s12 = smov 0  }
   0x9   :  { %s857_s13 = smov 0   ;;  %s859_s14 = smov 0  }
   0xa   :  { %s861_s15 = smov 0   ;;  %s863_s16 = smov 0  }
   0xb   :  { %s865_s17 = smov 0   ;;  %s867_s18 = smov 0  }
   0xc   :  { %s869_s19 = smov 0  }
   0xd LB: > { %s464_s20 = sadd.s32 4294967295, %s828_s19   ;;  %s465_s21 = sadd.s32 4294967294, %s828_s19   ;;  %s828_s19 = sphi %s869_s19, %s21_s19   ;;  %s824_s18 = sphi %s867_s18, %s1098_s18   ;;  %s820_s17 = sphi %s865_s17, %s1097_s17   ;;  %s816_s16 = sphi %s863_s16, %s1096_s16   ;;  %s812_s15 = sphi %s861_s15, %s1095_s15   ;;  %s808_s14 = sphi %s859_s14, %s1094_s14   ;;  %s804_s13 = sphi %s857_s13, %s1093_s13   ;;  %s800_s12 = sphi %s855_s12, %s1092_s12   ;;  %s796_s11 = sphi %s853_s11, %s1091_s11   ;;  %s792_s10 = sphi %s851_s10, %s1090_s10   ;;  %s788_s9 = sphi %s849_s9, %s1089_s9  }
   0xe   : > { %s36_s22 = sadd.s32 1, %s820_s17  ;;  %s40_s23 = sadd.s32 1, %s824_s18 }
   0xf   : > { %p38_p0 = scmp.ge.s32.totalorder %s36_s22, 2  ;;  %s49_s24 = sadd.s32 1, %s808_s14 }
  0x10   : > { %p56_p1 = scmp.ne.s32.totalorder %s808_s14, %s804_s13  ;;  %p57_p2 = scmp.eq.s32.totalorder %s828_s19, 0 }
  0x11   : > { %s1100_s22 = smov (%p38_p0, %s36_s22), 0  ;;  %s1102_s23 = smov (!%p38_p0, %s40_s23), %s824_s18 }
  0x12   : > { %1074 = sst [smem:[#allocation11_spill]] %s1100_s22  ;;  %s45_s25 = ssub.s32 %s820_s17, %s1100_s22 }
  0x13   : > { %p919_p3 = por %p57_p2, %p56_p1  ;;  %p42_p4 = scmp.ge.s32.totalorder %s1102_s23, 4 }
  0x14   : > { %p62_p5 = scmp.ne.s32.totalorder %s804_s13, %s800_s12  ;;  %p925_p6 = scmp.eq.s32.totalorder %s464_s20, 0 }
  0x15   : > { %p118_p7 = scmp.eq.s32.totalorder %s464_s20, 7  ;;  %s1104_s23 = smov (%p42_p4, %s1102_s23), 0 }
  0x16   : > { %1077 = sst [smem:[#allocation12_spill]] %s1104_s23  ;;  %p933_p8 = por %p925_p6, %p62_p5 }
  0x17   : > { %p937_p9 = por %p118_p7, %p56_p1  ;;  %s943_s30 = ssub.s32 %s824_s18, %s1104_s23 }
  0x18   : > { %p124_p10 = scmp.eq.s32.totalorder %s465_s21, 7  ;;  %s46_s3 = sor.u32 %s45_s25, %s943_s30 }
  0x19   : > { %p75_p11 = scmp.eq.s32.totalorder %s943_s30, 0  ;;  %p47_p12 = scmp.eq.s32.totalorder %s46_s3, 0 }
  0x1a   : > { %p947_p13 = por %p124_p10, %p62_p5  ;;  %p1072_p0 = scmp.lt.s32.totalorder %s828_s19, 8 }
  0x1b   : > { %s953_s5 = scalar_select %p47_p12, %s808_s14, %s49_s24  }
  0x1c   : > { %s1080_s4 = scalar_select %p947_p13, 1, 0 }
  0x1d   : > { %s144_s6 = sand.u32 1, %s808_s14   ;;  %s469_s7 = sshll.u32 %s820_s17, 1 }
  0x1e   : > { %1081 = sst [smem:[#allocation13_spill]] %s1080_s4  ;;  %s468_s8 = sshll.u32 %s144_s6, 3 }
  0x1f   : > { %s470_s20 = sshll.u32 %s824_s18, 2  ;;  %s148_s21 = scalar_lea.vmem [#allocation2], %s468_s8 }
  0x20   : > { %s153_s23 = sadd.s32 %s470_s20, %s469_s7  ;;  %s158_s25 = sshll.u32 %s148_s21, 4  ;;  %s159_s25 = int_to_ptr.vmem [resolvable:$true] %s158_s25 }
  0x21   : > { %s471_s3 = sshll.u32 %s153_s23, 2  ;;  %s1082_s0 = sld [smem:[#allocation14_spill]] }
  0x22   : > { %p538_p1 = pnand %p1072_p0, %p919_p3  ;;  %p475_p4 = scmp.ge.s32.totalorder %s828_s19, 1 }
  0x23   : > { %s145_s8 = scalar_lea.sflag [#allocation3], %s144_s6  ;;  %s830_s20 = smov 64  }
  0x24   : > { %s831_s23 = smov 4   ;;  %p189_p5 = scmp.lt.s32.totalorder %s828_s19, 9 }
  0x25   : > { %s77_s22 = sadd.s32 1, %s796_s11  ;;  %p84_p10 = scmp.ne.s32.totalorder %s796_s11, %s792_s10 }
  0x26   : > { %p967_p7 = pnand %p475_p4, %p189_p5  ;;  %p90_p12 = scmp.ne.s32.totalorder %s792_s10, %s788_s9 }
  0x27   : > { %s155_s24 = scalar_lea.hbm %s1082_s0, %s471_s3  ;;  %p86_p3 = por %p84_p10, %p57_p2 }
  0x28   : > { %s156_s7 = sshll.u32 %s155_s24, 4  ;;  %s168_s4 = sand.u32 1, %s796_s11   ;;  %s157_s7 = int_to_ptr.hbm [resolvable:$true] %s156_s7 }
  0x29   : > { %540 = dma.hbm_to_vmem [thread:$0]  (!%p538_p1), %s157_s7, 128, %s159_s25, %s145_s8, %s830_s20, %s830_s20, %s831_s23  }
  0x2a   : > { %s977_s26 = scalar_select %p75_p11, %s796_s11, %s77_s22  }
  0x2b   : > { %s521_s3 = sshll.u32 %s824_s18, 6  ;;  %p987_p0 = por %p90_p12, %p925_p6 }
  0x2c   : > { %s472_s25 = sshll.u32 %s168_s4, 6  ;;  %s178_s8 = scalar_lea.hbm %s1067_s1, %s521_s3 }
  0x2d   : > { %s179_s0 = sshll.u32 %s178_s8, 4  ;;  %s172_s30 = scalar_lea.vmem [#allocation5], %s472_s25  ;;  %s180_s0 = int_to_ptr.hbm [resolvable:$true] %s179_s0 }
  0x2e   : > { %s181_s22 = sshll.u32 %s172_s30, 4  ;;  %p1085_p11 = scmp.lt.s32.totalorder %s828_s19, 8  ;;  %s182_s22 = int_to_ptr.vmem [resolvable:$true] %s181_s22 }
  0x2f   : > { %s169_s9 = scalar_lea.sflag [#allocation6], %s168_s4  ;;  %193 = sbr.rel (%p967_p7) target bundleno = 227 (0xe3), region = 28 }
  0x30   : > { %p541_p2 = pnand %p1085_p11, %p86_p3  ;;  %s999_s27 = sand.u32 (!%p967_p7), 1, %s804_s13  }
  0x31   : > { %s476_s24 = sshll.u32 (!%p967_p7), %s999_s27, 3  ;;  %s196_s3 = scalar_lea.sflag (!%p967_p7), [#allocation3], %s999_s27 }
  0x32   : > { %543 = dma.hbm_to_vmem [thread:$0]  (!%p541_p2), %s180_s0, 1024, %s182_s22, %s169_s9, %s830_s20, %s830_s20, %s831_s23  }
  0x33   : > { %s199_s7 = scalar_lea.vmem (!%p967_p7), [#allocation2], %s476_s24 }
  0x34   : > { %775 = dma.done.wait (%p933_p8), %s196_s3, 128  }
  0x35   : > { %777 = vsyncadd (%p933_p8), %s196_s3, 4294967168  ;;  %s205_s0 = sand.u32 1, %s792_s10  }
  0x36   : > { %s477_s20 = sshll.u32 %s205_s0, 6  ;;  %s206_s23 = scalar_lea.sflag [#allocation6], %s205_s0 }
  0x37   : > { %s209_s21 = scalar_lea.vmem [#allocation5], %s477_s20 }
  0x38   : > { %779 = dma.done.wait (%p987_p0), %s206_s23, 1024  }
  0x39   : > { %781 = vsyncadd (%p987_p0), %s206_s23, 4294966272  ;;  %v530_v0 = vld [vmem:[%s209_s21 + $0x38] sm:$0xff]  ;;  %v529_v1 = vld [vmem:[%s209_s21 + $0x30] sm:$0xff]  ;;  %s516_s28 = sshll.u32 %s812_s15, 1  ;;  %s517_s4 = sshll.u32 %s816_s16, 2 }
  0x3a   : > { %310 = vmatpush.bf16.msra.mxu0 %v530_v0  ;;  %v528_v2 = vld [vmem:[%s209_s21 + $0x28] sm:$0xff]  ;;  %v527_v3 = vld [vmem:[%s209_s21 + $0x20] sm:$0xff]  ;;  %v526_v4 = vld [vmem:[%s209_s21 + $0x18] sm:$0xff]  ;;  %s339_s6 = sadd.s32 %s517_s4, %s516_s28  ;;  %s478_s25 = sshll.u32 %s999_s27, 4 }
  0x3b   : > { %v525_v5 = vld [vmem:[%s209_s21 + $0x10] sm:$0xff]  ;;  %v524_v6 = vld [vmem:[%s209_s21 + $0x8] sm:$0xff]  ;;  %v523_v7 = vld [vmem:[%s209_s21] sm:$0xff]  ;;  %s518_s8 = sshll.u32 %s339_s6, 3  ;;  %s235_s24 = scalar_lea.vmem [#allocation7], %s478_s25 }
  0x3c   : > { %v522_v8 = vld [vmem:[%s199_s7] sm:$0xff]  ;;  %s341_s9 = scalar_lea.hbm %s1068_s2, %s518_s8  ;;  %s342_s3 = sshll.u32 %s235_s24, 4  ;;  %s343_s3 = int_to_ptr.vmem [resolvable:$true] %s342_s3 }
  0x3d   : > { %s344_s0 = sshll.u32 %s341_s9, 4  ;;  %s327_s7 = scalar_lea.sflag [#allocation4], %s999_s27  ;;  %s345_s0 = int_to_ptr.hbm [resolvable:$true] %s344_s0 }
  0x3e   : > { %311 = vmatpush.bf16.msra.mxu0 %v529_v1  ;;  %s716_s15 = sshra.s32 %s345_s0, 4  ;;  %s722_s21 = scalar_lea.hbm %s1068_s2, 128  ;;  %s717_s15 = int_to_ptr.hbm [resolvable:$true] %s716_s15 }
  0x3f   : > { %s718_s16 = scalar_lea.hbm %s717_s15, 16  ;;  %p723_p1 = scmp.lt.s32.totalorder %s717_s15, %s1068_s2 }
  0x40   : > { %p719_p6 = scmp.ne.s32.totalorder %s717_s15, %s718_s16  ;;  %p724_p4 = scmp.lt.s32.totalorder %s722_s21, %s718_s16 }
  0x42   : > { %312 = vmatpush.bf16.msra.mxu0 %v528_v2  ;;  %p720_p8 = pnand %p719_p6, %p937_p9  ;;  %p725_p5 = por %p724_p4, %p723_p1 }
  0x44   : > { %p721_p0 = pneg %p720_p8 }
  0x46   : > { %313 = vmatpush.bf16.msra.mxu0 %v527_v3  ;;  %p726_p7 = pnand %p725_p5, %p721_p0 }
  0x4a   : > { %314 = vmatpush.bf16.msra.mxu0 %v526_v4 }
  0x4e   : > { %315 = vmatpush.bf16.msra.mxu0 %v525_v5 }
  0x52   : > { %316 = vmatpush.bf16.msra.mxu0 %v524_v6 }
  0x56   : > { %317 = vmatpush.bf16.msra.mxu0 %v523_v7 }
  0x59   : > { %318 = vmatmul.bf16.vlgmr.msra.gmra.mxu0 %v522_v8 }
  0xd6   : > { %v319_v9 = vpop.f32.mrf.mxu0 }
  0xd7   : > { %324 = vst [vmem:[%s235_s24] sm:$0xff] %v319_v9 }
  0xde   : > { %v321_v10 = vpop.f32.mrf.mxu0 }
  0xdf   : > { %325 = vst [vmem:[%s235_s24 + $0x8] sm:$0xff] %v321_v10 }
  0xe0   : > { %729 = shalt.err (!%p726_p7)
}
  0xe1   : > { %s832_s27 = smov 128   ;;  %s833_s6 = smov 8  }
  0xe2   : > { %535 = dma.vmem_to_hbm [thread:$0]  (%p937_p9), %s343_s3, 256, %s345_s0, %s327_s7, %s832_s27, %s832_s27, %s833_s6  }
  0xe3 PF: > { %p549_p10 = scmp.ge.s32.totalorder %s828_s19, 2  ;;  %s359_s8 = sand.u32 1, %s800_s12  }
  0xe4   : > { %s360_s30 = scalar_lea.sflag [#allocation4], %s359_s8 }
  0xe5   : > { %p545_p3 = pnand %p549_p10, %p947_p13 }
  0xe7   : > { %p546_p12 = pneg %p545_p3 }
  0xe9   : > { %783 = dma.done.wait (%p546_p12), %s360_s30, 256  }
  0xea   : > { %785 = vsyncadd (%p546_p12), %s360_s30, 4294967040  ;;  %s21_s19 = sadd.s32 1, %s828_s19   ;;  %s1087_s29 = sld [smem:[#allocation11_spill]] }
  0xeb   : > { %p18_p11 = scmp.ge.s32.totalorder %s21_s19, 10   ;;  %s1088_s22 = sld [smem:[#allocation12_spill]] }
  0xec   : > { %s1089_s9 = smov %s792_s10  ;;  %s1090_s10 = smov %s796_s11 }
  0xed   : > { %s1091_s11 = smov %s977_s26  ;;  %s1092_s12 = smov %s804_s13 }
  0xee   : > { %s1093_s13 = smov %s808_s14  ;;  %s1094_s14 = smov %s953_s5 }
  0xef   : > { %s1095_s15 = smov %s820_s17  ;;  %s1096_s16 = smov %s824_s18 }
  0xf0   : > { %s1097_s17 = smov %s1087_s29  ;;  %20 = sbr.rel (!%p18_p11) target bundleno = 13 (0xd), region = 86 }
  0xf1   : > { %s1098_s18 = smov %s1088_s22 }
  0xf5   :  { %366 = vsyncpa [#allocation3], 1 }
  0xf6   :  { %368 = vsyncpa [#allocation3 + $0x1], 1 }
  0xf7   :  { %369 = vsyncpa [#allocation6], 1 }
  0xf8   :  { %371 = vsyncpa [#allocation6 + $0x1], 1 }
  0xf9   :  { %372 = vsyncpa [#allocation4], 1 }
  0xfa   :  { %374 = vsyncpa [#allocation4 + $0x1], 1 }

</bundles_post_ra>
